<compile_context>
chip_gen: v6e
topology: v6e:2x2x1
jax: 0.10.0
libtpu: 0.0.40
codegen_flags: <defaults>
</compile_context>

<pallas_src>
import math
from functools import partial

import jax
import jax.numpy as jnp
from jax import lax
from jax.experimental import pallas as pl


def _layer_norm_fused(x, eps=1e-5):
    """LayerNorm(elementwise_affine=False) over the last dim, single-pass statistics."""
    inv_n = 1.0 / x.shape[-1]
    mu = jnp.sum(x, axis=-1, keepdims=True) * inv_n
    ms = jnp.sum(x * x, axis=-1, keepdims=True) * inv_n
    var = jnp.maximum(ms - mu * mu, 0.0)
    return (x - mu) * lax.rsqrt(var + eps)


def _mlp_block(x, w1, b1, w2, b2, mxu_dtype):
    """MLP([D, D, key_size]) = (LN -> ReLU -> Linear) x 2.  LN math stays in f32."""
    x = jnp.maximum(_layer_norm_fused(x), 0.0)
    x = jnp.dot(x.astype(mxu_dtype), w1.astype(mxu_dtype),
                preferred_element_type=jnp.float32) + b1
    x = jnp.maximum(_layer_norm_fused(x), 0.0)
    x = jnp.dot(x.astype(mxu_dtype), w2.astype(mxu_dtype),
                preferred_element_type=jnp.float32) + b2
    return x


def pointer_logits_kernel(q_ref, k_ref,
                          wq1_ref, bq1_ref, wq2_ref, bq2_ref,
                          wk1_ref, bk1_ref, wk2_ref, bk2_ref,
                          out_ref, *, B, Sq, Sk, denom, mxu_dtype):
    q = q_ref[...]                      # (B*Sq, Q_in)  f32
    k = k_ref[...]                      # (B*Sk, K_in)  f32

    q = _mlp_block(q, wq1_ref[...], bq1_ref[...], wq2_ref[...], bq2_ref[...], mxu_dtype)
    k = _mlp_block(k, wk1_ref[...], bk1_ref[...], wk2_ref[...], bk2_ref[...], mxu_dtype)

    # Fold the 1/sqrt(key_size) scale into the query activations (pre-matmul).
    q = (q * denom).astype(mxu_dtype)
    k = k.astype(mxu_dtype)

    # logits[b] = keys[b] @ query[b]^T — contract last dims directly (no explicit .T).
    dn = (((1,), (1,)), ((), ()))
    for b in range(B):                  # B is static; unrolled, all slices are static.
        qb = q[b * Sq:(b + 1) * Sq]     # (Sq, key)
        kb = k[b * Sk:(b + 1) * Sk]     # (Sk, key)
        out_ref[b] = lax.dot_general(
            kb, qb, dn, preferred_element_type=jnp.float32).astype(out_ref.dtype)


def pointer_logits(query, keys, params, key_size, *, mxu_dtype=jnp.float32):
    """query: (B, Sq, Q_in), keys: (B, Sk, K_in); Linear weights stored (in, out),
    biases (1, out).  Returns logits of shape (B, Sk, Sq).
    Set mxu_dtype=jnp.bfloat16 on v6e/v7x for the fast MXU path (accumulation stays f32)."""
    B, Sq, Qin = query.shape
    _, Sk, Kin = keys.shape
    denom = 1.0 / math.sqrt(key_size)
    wq1, bq1, wq2, bq2, wk1, bk1, wk2, bk2 = params

    # Flatten batch into the sublane dim so each MLP runs as one matmul (free XLA reshape).
    q_flat = query.reshape(B * Sq, Qin)
    k_flat = keys.reshape(B * Sk, Kin)

    flops = 2 * B * (Sq * Qin * Qin + Sq * Qin * key_size
                     + Sk * Kin * Kin + Sk * Kin * key_size
                     + Sk * Sq * key_size)
    transcendentals = 2 * B * (Sq + Sk)               # one rsqrt per row per LayerNorm
    bytes_accessed = 4 * (q_flat.size + k_flat.size + B * Sk * Sq
                          + sum(p.size for p in params))

    kernel = partial(pointer_logits_kernel, B=B, Sq=Sq, Sk=Sk,
                     denom=denom, mxu_dtype=mxu_dtype)

    # TODO(synk): if Sq/Sk/B grow so the activations + (B, Sk, Sq) output no longer fit
    # comfortably in VMEM (notably v7x's 64 MiB), reintroduce a ("parallel") grid axis
    # over batch/Sk with a lane-dense (>=128) output tiling and an explicit vmem_limit.
    return pl.pallas_call(
        kernel,
        out_shape=jax.ShapeDtypeStruct((B, Sk, Sq), jnp.float32),
        cost_estimate=pl.CostEstimate(flops=flops,
                                      transcendentals=transcendentals,
                                      bytes_accessed=bytes_accessed),
    )(q_flat, k_flat, wq1, bq1, wq2, bq2, wk1, bk1, wk2, bk2)


# -----------------------------------------------------------------------------
# Independent reference mirroring the PyTorch module literally:
# (LN(eps=1e-5, affine=False) -> ReLU -> Linear) x 2 per MLP, then keys @ qᵀ / sqrt(key).
def reference(query, keys, params, key_size):
    wq1, bq1, wq2, bq2, wk1, bk1, wk2, bk2 = params

    def ln(x, eps=1e-5):
        mu = jnp.mean(x, axis=-1, keepdims=True)
        var = jnp.mean((x - mu) ** 2, axis=-1, keepdims=True)
        return (x - mu) / jnp.sqrt(var + eps)

    def mlp(x, w1, b1, w2, b2):
        x = jnp.dot(jax.nn.relu(ln(x)), w1) + b1
        x = jnp.dot(jax.nn.relu(ln(x)), w2) + b2
        return x

    q = mlp(query, wq1, bq1, wq2, bq2)
    k = mlp(keys, wk1, bk1, wk2, bk2)
    return jnp.einsum("bkd,bqd->bkq", k, q) / math.sqrt(key_size)


def _init_linear(key, fan_in, fan_out):
    # Deterministic synthetic init (~ PyTorch Linear default: U(-1/sqrt(fan_in), +)).
    kw, kb = jax.random.split(key)
    bound = 1.0 / math.sqrt(fan_in)
    w = jax.random.uniform(kw, (fan_in, fan_out), jnp.float32, -bound, bound)
    b = jax.random.uniform(kb, (1, fan_out), jnp.float32, -bound, bound)
    return w, b


if __name__ == "__main__":
    B, Sq, Sk = 2, 8, 8
    query_input_size, keys_input_size, key_size = 32, 32, 64

    root = jax.random.PRNGKey(0)
    kq, kk, k1, k2, k3, k4 = jax.random.split(root, 6)

    query = jax.random.normal(kq, (B, Sq, query_input_size), jnp.float32)
    keys = jax.random.normal(kk, (B, Sk, keys_input_size), jnp.float32)

    # query_mlp: Linear(Q,Q), Linear(Q,key_size); keys_mlp: Linear(K,K), Linear(K,key_size)
    wq1, bq1 = _init_linear(k1, query_input_size, query_input_size)
    wq2, bq2 = _init_linear(k2, query_input_size, key_size)
    wk1, bk1 = _init_linear(k3, keys_input_size, keys_input_size)
    wk2, bk2 = _init_linear(k4, keys_input_size, key_size)
    params = (wq1, bq1, wq2, bq2, wk1, bk1, wk2, bk2)

    out = jax.block_until_ready(pointer_logits(query, keys, params, key_size))
    ref = jax.block_until_ready(reference(query, keys, params, key_size))

    assert out.shape == (B, Sk, Sq)
    assert jnp.allclose(out, ref, atol=1e-4, rtol=1e-4), float(jnp.max(jnp.abs(out - ref)))

    print("KERNEL_OK")
</pallas_src>

<mosaic_0001>
module attributes {stable_mosaic.version = 11 : i64} {
  func.func @pointer_logits_kernel(%arg0: memref<16x32xf32, #tpu.memory_space<vmem>>, %arg1: memref<16x32xf32, #tpu.memory_space<vmem>>, %arg2: memref<32x32xf32, #tpu.memory_space<vmem>>, %arg3: memref<1x32xf32, #tpu.memory_space<vmem>>, %arg4: memref<32x64xf32, #tpu.memory_space<vmem>>, %arg5: memref<1x64xf32, #tpu.memory_space<vmem>>, %arg6: memref<32x32xf32, #tpu.memory_space<vmem>>, %arg7: memref<1x32xf32, #tpu.memory_space<vmem>>, %arg8: memref<32x64xf32, #tpu.memory_space<vmem>>, %arg9: memref<1x64xf32, #tpu.memory_space<vmem>>, %arg10: memref<2x8x8xf32, #tpu.memory_space<vmem>>) attributes {dimension_semantics = [], scalar_prefetch = 0 : i64, scratch_operands = 0 : i64, tpu.core_type = #tpu.core_type<tc>} {
    %c0 = arith.constant 0 : index
    %c0_0 = arith.constant 0 : index
    %0 = vector.load %arg0[%c0, %c0_0] : memref<16x32xf32, #tpu.memory_space<vmem>>, vector<16x32xf32>
    %c0_1 = arith.constant 0 : index
    %c0_2 = arith.constant 0 : index
    %1 = vector.load %arg1[%c0_1, %c0_2] : memref<16x32xf32, #tpu.memory_space<vmem>>, vector<16x32xf32>
    %c0_3 = arith.constant 0 : index
    %c0_4 = arith.constant 0 : index
    %2 = vector.load %arg2[%c0_3, %c0_4] : memref<32x32xf32, #tpu.memory_space<vmem>>, vector<32x32xf32>
    %c0_5 = arith.constant 0 : index
    %c0_6 = arith.constant 0 : index
    %3 = vector.load %arg3[%c0_5, %c0_6] : memref<1x32xf32, #tpu.memory_space<vmem>>, vector<1x32xf32>
    %c0_7 = arith.constant 0 : index
    %c0_8 = arith.constant 0 : index
    %4 = vector.load %arg4[%c0_7, %c0_8] : memref<32x64xf32, #tpu.memory_space<vmem>>, vector<32x64xf32>
    %c0_9 = arith.constant 0 : index
    %c0_10 = arith.constant 0 : index
    %5 = vector.load %arg5[%c0_9, %c0_10] : memref<1x64xf32, #tpu.memory_space<vmem>>, vector<1x64xf32>
    %cst = arith.constant dense<0.000000e+00> : vector<16xf32>
    %6 = vector.multi_reduction <add>, %0, %cst [1] : vector<16x32xf32> to vector<16xf32>
    %7 = vector.shape_cast %6 : vector<16xf32> to vector<16x1xf32>
    %cst_11 = arith.constant 3.125000e-02 : f32
    %8 = vector.broadcast %cst_11 : f32 to vector<16x1xf32>
    %9 = arith.mulf %7, %8 : vector<16x1xf32>
    %10 = arith.mulf %0, %0 : vector<16x32xf32>
    %cst_12 = arith.constant dense<0.000000e+00> : vector<16xf32>
    %11 = vector.multi_reduction <add>, %10, %cst_12 [1] : vector<16x32xf32> to vector<16xf32>
    %12 = vector.shape_cast %11 : vector<16xf32> to vector<16x1xf32>
    %cst_13 = arith.constant 3.125000e-02 : f32
    %13 = vector.broadcast %cst_13 : f32 to vector<16x1xf32>
    %14 = arith.mulf %12, %13 : vector<16x1xf32>
    %15 = arith.mulf %9, %9 : vector<16x1xf32>
    %16 = arith.subf %14, %15 : vector<16x1xf32>
    %cst_14 = arith.constant 0.000000e+00 : f32
    %17 = vector.broadcast %cst_14 : f32 to vector<16x1xf32>
    %18 = arith.maximumf %16, %17 : vector<16x1xf32>
    %19 = vector.broadcast %9 : vector<16x1xf32> to vector<16x32xf32>
    %20 = arith.subf %0, %19 : vector<16x32xf32>
    %cst_15 = arith.constant 9.99999974E-6 : f32
    %21 = vector.broadcast %cst_15 : f32 to vector<16x1xf32>
    %22 = arith.addf %18, %21 : vector<16x1xf32>
    %23 = math.rsqrt %22 : vector<16x1xf32>
    %24 = vector.broadcast %23 : vector<16x1xf32> to vector<16x32xf32>
    %25 = arith.mulf %20, %24 : vector<16x32xf32>
    %cst_16 = arith.constant 0.000000e+00 : f32
    %26 = vector.broadcast %cst_16 : f32 to vector<16x32xf32>
    %27 = arith.maximumf %25, %26 : vector<16x32xf32>
    %cst_17 = arith.constant dense<0.000000e+00> : vector<16x32xf32>
    %28 = tpu.matmul %27, %2, %cst_17 {dimension_numbers = #tpu.dot_dimension_numbers<[1], [0], [0], [1], [0, 0, 1, 1], [], []>} : vector<16x32xf32>, vector<32x32xf32>, vector<16x32xf32> -> vector<16x32xf32>
    %29 = vector.broadcast %3 : vector<1x32xf32> to vector<16x32xf32>
    %30 = arith.addf %28, %29 : vector<16x32xf32>
    %cst_18 = arith.constant dense<0.000000e+00> : vector<16xf32>
    %31 = vector.multi_reduction <add>, %30, %cst_18 [1] : vector<16x32xf32> to vector<16xf32>
    %32 = vector.shape_cast %31 : vector<16xf32> to vector<16x1xf32>
    %cst_19 = arith.constant 3.125000e-02 : f32
    %33 = vector.broadcast %cst_19 : f32 to vector<16x1xf32>
    %34 = arith.mulf %32, %33 : vector<16x1xf32>
    %35 = arith.mulf %30, %30 : vector<16x32xf32>
    %cst_20 = arith.constant dense<0.000000e+00> : vector<16xf32>
    %36 = vector.multi_reduction <add>, %35, %cst_20 [1] : vector<16x32xf32> to vector<16xf32>
    %37 = vector.shape_cast %36 : vector<16xf32> to vector<16x1xf32>
    %cst_21 = arith.constant 3.125000e-02 : f32
    %38 = vector.broadcast %cst_21 : f32 to vector<16x1xf32>
    %39 = arith.mulf %37, %38 : vector<16x1xf32>
    %40 = arith.mulf %34, %34 : vector<16x1xf32>
    %41 = arith.subf %39, %40 : vector<16x1xf32>
    %cst_22 = arith.constant 0.000000e+00 : f32
    %42 = vector.broadcast %cst_22 : f32 to vector<16x1xf32>
    %43 = arith.maximumf %41, %42 : vector<16x1xf32>
    %44 = vector.broadcast %34 : vector<16x1xf32> to vector<16x32xf32>
    %45 = arith.subf %30, %44 : vector<16x32xf32>
    %cst_23 = arith.constant 9.99999974E-6 : f32
    %46 = vector.broadcast %cst_23 : f32 to vector<16x1xf32>
    %47 = arith.addf %43, %46 : vector<16x1xf32>
    %48 = math.rsqrt %47 : vector<16x1xf32>
    %49 = vector.broadcast %48 : vector<16x1xf32> to vector<16x32xf32>
    %50 = arith.mulf %45, %49 : vector<16x32xf32>
    %cst_24 = arith.constant 0.000000e+00 : f32
    %51 = vector.broadcast %cst_24 : f32 to vector<16x32xf32>
    %52 = arith.maximumf %50, %51 : vector<16x32xf32>
    %cst_25 = arith.constant dense<0.000000e+00> : vector<16x64xf32>
    %53 = tpu.matmul %52, %4, %cst_25 {dimension_numbers = #tpu.dot_dimension_numbers<[1], [0], [0], [1], [0, 0, 1, 1], [], []>} : vector<16x32xf32>, vector<32x64xf32>, vector<16x64xf32> -> vector<16x64xf32>
    %54 = vector.broadcast %5 : vector<1x64xf32> to vector<16x64xf32>
    %55 = arith.addf %53, %54 : vector<16x64xf32>
    %c0_26 = arith.constant 0 : index
    %c0_27 = arith.constant 0 : index
    %56 = vector.load %arg6[%c0_26, %c0_27] : memref<32x32xf32, #tpu.memory_space<vmem>>, vector<32x32xf32>
    %c0_28 = arith.constant 0 : index
    %c0_29 = arith.constant 0 : index
    %57 = vector.load %arg7[%c0_28, %c0_29] : memref<1x32xf32, #tpu.memory_space<vmem>>, vector<1x32xf32>
    %c0_30 = arith.constant 0 : index
    %c0_31 = arith.constant 0 : index
    %58 = vector.load %arg8[%c0_30, %c0_31] : memref<32x64xf32, #tpu.memory_space<vmem>>, vector<32x64xf32>
    %c0_32 = arith.constant 0 : index
    %c0_33 = arith.constant 0 : index
    %59 = vector.load %arg9[%c0_32, %c0_33] : memref<1x64xf32, #tpu.memory_space<vmem>>, vector<1x64xf32>
    %cst_34 = arith.constant dense<0.000000e+00> : vector<16xf32>
    %60 = vector.multi_reduction <add>, %1, %cst_34 [1] : vector<16x32xf32> to vector<16xf32>
    %61 = vector.shape_cast %60 : vector<16xf32> to vector<16x1xf32>
    %cst_35 = arith.constant 3.125000e-02 : f32
    %62 = vector.broadcast %cst_35 : f32 to vector<16x1xf32>
    %63 = arith.mulf %61, %62 : vector<16x1xf32>
    %64 = arith.mulf %1, %1 : vector<16x32xf32>
    %cst_36 = arith.constant dense<0.000000e+00> : vector<16xf32>
    %65 = vector.multi_reduction <add>, %64, %cst_36 [1] : vector<16x32xf32> to vector<16xf32>
    %66 = vector.shape_cast %65 : vector<16xf32> to vector<16x1xf32>
    %cst_37 = arith.constant 3.125000e-02 : f32
    %67 = vector.broadcast %cst_37 : f32 to vector<16x1xf32>
    %68 = arith.mulf %66, %67 : vector<16x1xf32>
    %69 = arith.mulf %63, %63 : vector<16x1xf32>
    %70 = arith.subf %68, %69 : vector<16x1xf32>
    %cst_38 = arith.constant 0.000000e+00 : f32
    %71 = vector.broadcast %cst_38 : f32 to vector<16x1xf32>
    %72 = arith.maximumf %70, %71 : vector<16x1xf32>
    %73 = vector.broadcast %63 : vector<16x1xf32> to vector<16x32xf32>
    %74 = arith.subf %1, %73 : vector<16x32xf32>
    %cst_39 = arith.constant 9.99999974E-6 : f32
    %75 = vector.broadcast %cst_39 : f32 to vector<16x1xf32>
    %76 = arith.addf %72, %75 : vector<16x1xf32>
    %77 = math.rsqrt %76 : vector<16x1xf32>
    %78 = vector.broadcast %77 : vector<16x1xf32> to vector<16x32xf32>
    %79 = arith.mulf %74, %78 : vector<16x32xf32>
    %cst_40 = arith.constant 0.000000e+00 : f32
    %80 = vector.broadcast %cst_40 : f32 to vector<16x32xf32>
    %81 = arith.maximumf %79, %80 : vector<16x32xf32>
    %cst_41 = arith.constant dense<0.000000e+00> : vector<16x32xf32>
    %82 = tpu.matmul %81, %56, %cst_41 {dimension_numbers = #tpu.dot_dimension_numbers<[1], [0], [0], [1], [0, 0, 1, 1], [], []>} : vector<16x32xf32>, vector<32x32xf32>, vector<16x32xf32> -> vector<16x32xf32>
    %83 = vector.broadcast %57 : vector<1x32xf32> to vector<16x32xf32>
    %84 = arith.addf %82, %83 : vector<16x32xf32>
    %cst_42 = arith.constant dense<0.000000e+00> : vector<16xf32>
    %85 = vector.multi_reduction <add>, %84, %cst_42 [1] : vector<16x32xf32> to vector<16xf32>
    %86 = vector.shape_cast %85 : vector<16xf32> to vector<16x1xf32>
    %cst_43 = arith.constant 3.125000e-02 : f32
    %87 = vector.broadcast %cst_43 : f32 to vector<16x1xf32>
    %88 = arith.mulf %86, %87 : vector<16x1xf32>
    %89 = arith.mulf %84, %84 : vector<16x32xf32>
    %cst_44 = arith.constant dense<0.000000e+00> : vector<16xf32>
    %90 = vector.multi_reduction <add>, %89, %cst_44 [1] : vector<16x32xf32> to vector<16xf32>
    %91 = vector.shape_cast %90 : vector<16xf32> to vector<16x1xf32>
    %cst_45 = arith.constant 3.125000e-02 : f32
    %92 = vector.broadcast %cst_45 : f32 to vector<16x1xf32>
    %93 = arith.mulf %91, %92 : vector<16x1xf32>
    %94 = arith.mulf %88, %88 : vector<16x1xf32>
    %95 = arith.subf %93, %94 : vector<16x1xf32>
    %cst_46 = arith.constant 0.000000e+00 : f32
    %96 = vector.broadcast %cst_46 : f32 to vector<16x1xf32>
    %97 = arith.maximumf %95, %96 : vector<16x1xf32>
    %98 = vector.broadcast %88 : vector<16x1xf32> to vector<16x32xf32>
    %99 = arith.subf %84, %98 : vector<16x32xf32>
    %cst_47 = arith.constant 9.99999974E-6 : f32
    %100 = vector.broadcast %cst_47 : f32 to vector<16x1xf32>
    %101 = arith.addf %97, %100 : vector<16x1xf32>
    %102 = math.rsqrt %101 : vector<16x1xf32>
    %103 = vector.broadcast %102 : vector<16x1xf32> to vector<16x32xf32>
    %104 = arith.mulf %99, %103 : vector<16x32xf32>
    %cst_48 = arith.constant 0.000000e+00 : f32
    %105 = vector.broadcast %cst_48 : f32 to vector<16x32xf32>
    %106 = arith.maximumf %104, %105 : vector<16x32xf32>
    %cst_49 = arith.constant dense<0.000000e+00> : vector<16x64xf32>
    %107 = tpu.matmul %106, %58, %cst_49 {dimension_numbers = #tpu.dot_dimension_numbers<[1], [0], [0], [1], [0, 0, 1, 1], [], []>} : vector<16x32xf32>, vector<32x64xf32>, vector<16x64xf32> -> vector<16x64xf32>
    %108 = vector.broadcast %59 : vector<1x64xf32> to vector<16x64xf32>
    %109 = arith.addf %107, %108 : vector<16x64xf32>
    %cst_50 = arith.constant 1.250000e-01 : f32
    %110 = vector.broadcast %cst_50 : f32 to vector<16x64xf32>
    %111 = arith.mulf %55, %110 : vector<16x64xf32>
    %112 = vector.extract_strided_slice %111 {offsets = [0, 0], sizes = [8, 64], strides = [1, 1]} : vector<16x64xf32> to vector<8x64xf32>
    %113 = vector.extract_strided_slice %109 {offsets = [0, 0], sizes = [8, 64], strides = [1, 1]} : vector<16x64xf32> to vector<8x64xf32>
    %cst_51 = arith.constant dense<0.000000e+00> : vector<8x8xf32>
    %114 = tpu.matmul %113, %112, %cst_51 {dimension_numbers = #tpu.dot_dimension_numbers<[1], [1], [0], [0], [0, 0, 1, 0], [], []>} : vector<8x64xf32>, vector<8x64xf32>, vector<8x8xf32> -> vector<8x8xf32>
    %c0_52 = arith.constant 0 : index
    %c0_53 = arith.constant 0 : index
    %c0_54 = arith.constant 0 : index
    %115 = vector.load %arg10[%c0_52, %c0_53, %c0_54] : memref<2x8x8xf32, #tpu.memory_space<vmem>>, vector<1x8x8xf32>
    %116 = vector.shape_cast %115 : vector<1x8x8xf32> to vector<8x8xf32>
    %117 = vector.shape_cast %114 : vector<8x8xf32> to vector<1x8x8xf32>
    tpu.vector_store %arg10[%c0_52, %c0_53, %c0_54], %117 {strides = array<i32>} : memref<2x8x8xf32, #tpu.memory_space<vmem>>, vector<1x8x8xf32>,
    %118 = vector.extract_strided_slice %111 {offsets = [8, 0], sizes = [8, 64], strides = [1, 1]} : vector<16x64xf32> to vector<8x64xf32>
    %119 = vector.extract_strided_slice %109 {offsets = [8, 0], sizes = [8, 64], strides = [1, 1]} : vector<16x64xf32> to vector<8x64xf32>
    %cst_55 = arith.constant dense<0.000000e+00> : vector<8x8xf32>
    %120 = tpu.matmul %119, %118, %cst_55 {dimension_numbers = #tpu.dot_dimension_numbers<[1], [1], [0], [0], [0, 0, 1, 0], [], []>} : vector<8x64xf32>, vector<8x64xf32>, vector<8x8xf32> -> vector<8x8xf32>
    %c1 = arith.constant 1 : index
    %c0_56 = arith.constant 0 : index
    %c0_57 = arith.constant 0 : index
    %121 = vector.load %arg10[%c1, %c0_56, %c0_57] : memref<2x8x8xf32, #tpu.memory_space<vmem>>, vector<1x8x8xf32>
    %122 = vector.shape_cast %121 : vector<1x8x8xf32> to vector<8x8xf32>
    %123 = vector.shape_cast %120 : vector<8x8xf32> to vector<1x8x8xf32>
    tpu.vector_store %arg10[%c1, %c0_56, %c0_57], %123 {strides = array<i32>} : memref<2x8x8xf32, #tpu.memory_space<vmem>>, vector<1x8x8xf32>,
    return
  }
}

</mosaic_0001>

<bundles_post_ra>
// kernel: tpu_custom_call.1
= control target key start
LH: loop header
LB: loop body
LE: loop exit
PB: predicated region body
PF: predicated region fallthrough
CT: control target
= control target key end

     0   :  { %15 = vsyncpa [#allocation3], 0  ;;  %s1273_s0 = inlined_call_operand.hbm [shape: f32[16,32], index: 0, kind: input, shape index: {}]   ;;  %s1274_s1 = inlined_call_operand.hbm [shape: f32[16,32], index: 1, kind: input, shape index: {}]   ;;  %s1275_s2 = inlined_call_operand.hbm [shape: f32[32,32], index: 2, kind: input, shape index: {}]   ;;  %s1276_s3 = inlined_call_operand.vmem [shape: f32[1,32], index: 3, kind: input, shape index: {}]   ;;  %s1277_s4 = inlined_call_operand.hbm [shape: f32[32,64], index: 4, kind: input, shape index: {}]   ;;  %s1278_s5 = inlined_call_operand.vmem [shape: f32[1,64], index: 5, kind: input, shape index: {}]   ;;  %s1279_s6 = inlined_call_operand.hbm [shape: f32[32,32], index: 6, kind: input, shape index: {}]   ;;  %s1280_s7 = inlined_call_operand.vmem [shape: f32[1,32], index: 7, kind: input, shape index: {}]   ;;  %s1281_s8 = inlined_call_operand.hbm [shape: f32[32,64], index: 8, kind: input, shape index: {}]   ;;  %s1282_s9 = inlined_call_operand.vmem [shape: f32[1,64], index: 9, kind: input, shape index: {}]   ;;  %s1283_s10 = inlined_call_operand.hbm [shape: f32[2,8,8], index: 10, kind: output, shape index: {}]  }
   0x1   :  { %16 = vsyncpa [#allocation6], 0 }
   0x2   :  { %17 = vsyncpa [#allocation9], 0 }
   0x3   :  { %18 = vsyncpa [#allocation12], 0 }
   0x4   :  { %19 = vsyncpa [#allocation4], 0  ;;  %s1081_s13 = smov [#allocation5]   ;;  %s1082_s15 = smov [#allocation8]  }
   0x5   :  { %s37_s14 = sshll.u32 %s1081_s13, 4  ;;  %s63_s16 = sshll.u32 %s1082_s15, 4  ;;  %s38_s14 = int_to_ptr.vmem [resolvable:$true] %s37_s14  ;;  %s64_s16 = int_to_ptr.vmem [resolvable:$true] %s63_s16 }
   0x6   :  { %s939_s17 = scalar_lea.vmem %s38_s14, 256  ;;  %p944_p1 = scmp.lt.s32.totalorder %s38_s14, %s38_s14 }
   0x7   :  { %p940_p0 = scmp.ne.s32.totalorder %s38_s14, %s939_s17  ;;  %p945_p2 = scmp.lt.s32.totalorder %s939_s17, %s939_s17 }
   0x9   :  { %p946_p3 = por %p945_p2, %p944_p1 }
   0xb   :  { %p947_p4 = pnand %p946_p3, %p940_p0 }
   0xd   :  { %950 = shalt.err (!%p947_p4)
}
   0xe   :  { %s1083_s18 = smov 128   ;;  %s1084_s19 = smov 8  }
   0xf   :  { %43 = dma.hbm_to_vmem [thread:$0]  %s1274_s1, 256, %s38_s14, [#allocation6], %s1083_s18, %s1083_s18, %s1084_s19  }
  0x10   :  { %s959_s22 = scalar_lea.vmem %s64_s16, 512  ;;  %p964_p6 = scmp.lt.s32.totalorder %s64_s16, %s64_s16 }
  0x11   :  { %p960_p5 = scmp.ne.s32.totalorder %s64_s16, %s959_s22  ;;  %p965_p7 = scmp.lt.s32.totalorder %s959_s22, %s959_s22 }
  0x13   :  { %p966_p8 = por %p965_p7, %p964_p6 }
  0x15   :  { %p967_p9 = pnand %p966_p8, %p960_p5 }
  0x17   :  { %970 = shalt.err (!%p967_p9)
}
  0x18   :  { %69 = dma.hbm_to_vmem [thread:$0]  %s1277_s4, 512, %s64_s16, [#allocation9], %s1083_s18, %s1083_s18, %s1084_s19  }
  0x19   :  { %s1085_s25 = smov [#allocation2]   ;;  %s1086_s27 = smov [#allocation7]  }
  0x1a   :  { %s25_s26 = sshll.u32 %s1085_s25, 4  ;;  %s49_s28 = sshll.u32 %s1086_s27, 4  ;;  %s26_s26 = int_to_ptr.vmem [resolvable:$true] %s25_s26  ;;  %s50_s28 = int_to_ptr.vmem [resolvable:$true] %s49_s28 }
  0x1b   :  { %s979_s1 = scalar_lea.vmem %s26_s26, 256  ;;  %p984_p11 = scmp.lt.s32.totalorder %s26_s26, %s26_s26 }
  0x1c   :  { %p980_p10 = scmp.ne.s32.totalorder %s26_s26, %s979_s1  ;;  %p985_p12 = scmp.lt.s32.totalorder %s979_s1, %s979_s1 }
  0x1e   :  { %p986_p13 = por %p985_p12, %p984_p11 }
  0x20   :  { %p987_p0 = pnand %p986_p13, %p980_p10 }
  0x22   :  { %990 = shalt.err (!%p987_p0)
}
  0x23   :  { %31 = dma.hbm_to_vmem [thread:$0]  %s1273_s0, 256, %s26_s26, [#allocation3], %s1083_s18, %s1083_s18, %s1084_s19  }
  0x24   :  { %s999_s4 = scalar_lea.vmem %s50_s28, 512  ;;  %p1004_p2 = scmp.lt.s32.totalorder %s50_s28, %s50_s28 }
  0x25   :  { %p1000_p1 = scmp.ne.s32.totalorder %s50_s28, %s999_s4  ;;  %p1005_p3 = scmp.lt.s32.totalorder %s999_s4, %s999_s4 }
  0x27   :  { %p1006_p4 = por %p1005_p3, %p1004_p2 }
  0x29   :  { %p1007_p5 = pnand %p1006_p4, %p1000_p1 }
  0x2b   :  { %1010 = shalt.err (!%p1007_p5)
}
  0x2c   :  { %55 = dma.hbm_to_vmem [thread:$0]  %s1275_s2, 512, %s50_s28, [#allocation6], %s1083_s18, %s1083_s18, %s1084_s19  }
  0x2d   :  { %s1087_s13 = smov [#allocation10]   ;;  %s1088_s15 = smov [#allocation11]  }
  0x2e   :  { %s77_s14 = sshll.u32 %s1087_s13, 4  ;;  %s91_s16 = sshll.u32 %s1088_s15, 4  ;;  %s78_s14 = int_to_ptr.vmem [resolvable:$true] %s77_s14  ;;  %s92_s16 = int_to_ptr.vmem [resolvable:$true] %s91_s16 }
  0x2f   :  { %s1019_s0 = scalar_lea.vmem %s78_s14, 512  ;;  %p1024_p7 = scmp.lt.s32.totalorder %s78_s14, %s78_s14 }
  0x30   :  { %p1020_p6 = scmp.ne.s32.totalorder %s78_s14, %s1019_s0  ;;  %p1025_p8 = scmp.lt.s32.totalorder %s1019_s0, %s1019_s0 }
  0x32   :  { %p1026_p9 = por %p1025_p8, %p1024_p7 }
  0x34   :  { %p1027_p10 = pnand %p1026_p9, %p1020_p6 }
  0x36   :  { %1030 = shalt.err (!%p1027_p10)
}
  0x37   :  { %83 = dma.hbm_to_vmem [thread:$0]  %s1279_s6, 512, %s78_s14, [#allocation9], %s1083_s18, %s1083_s18, %s1084_s19  }
  0x38   :  { %s1039_s2 = scalar_lea.vmem %s92_s16, 512  ;;  %p1044_p12 = scmp.lt.s32.totalorder %s92_s16, %s92_s16 }
  0x39   :  { %p1040_p11 = scmp.ne.s32.totalorder %s92_s16, %s1039_s2  ;;  %p1045_p13 = scmp.lt.s32.totalorder %s1039_s2, %s1039_s2 }
  0x3b   :  { %p1046_p0 = por %p1045_p13, %p1044_p12 }
  0x3d   :  { %p1047_p1 = pnand %p1046_p0, %p1040_p11 }
  0x3f   :  { %1050 = shalt.err (!%p1047_p1)
}
  0x40   :  { %97 = dma.hbm_to_vmem [thread:$0]  %s1281_s8, 512, %s92_s16, [#allocation12], %s1083_s18, %s1083_s18, %s1084_s19  }
  0x41   :  { %1071 = dma.done.wait [#allocation3], 256  }
  0x42   :  { %1072 = vsyncadd [#allocation3], 4294967040 }
  0x43   :  { %1073 = dma.done.wait [#allocation6], 768  }
  0x44   :  { %1074 = vsyncadd [#allocation6], 4294966528 }
  0x45   :  { %1075 = dma.done.wait [#allocation9], 1024  }
  0x46   :  { %1076 = vsyncadd [#allocation9], 4294966272 }
  0x47   :  { %1077 = dma.done.wait [#allocation12], 512  }
  0x48   :  { %1078 = vsyncadd [#allocation12], 4294966784  ;;  %vm132_vm0 = vcmask 261120   ;;  %v1183_v0 = vld [vmem:[#allocation2] sm:$0xff]  ;;  %v1185_v1 = vld [vmem:[#allocation2 + $0x8] sm:$0xff]  ;;  %vm1090_vm1 = vmmov 0  }
  0x49   :  { %v133_v2 = vsel %vm132_vm0, %v1183_v0, 0.0  ;;  %v141_v3 = vmul.f32 %v1183_v0, %v1183_v0  ;;  %v142_v4 = vmul.f32 %v1185_v1, %v1185_v1  ;;  %v136_v6 = vsel %vm132_vm0, %v1185_v1, 0.0  ;;  %v1196_v7 = vld [vmem:[#allocation5] sm:$0xff]  ;;  %v1199_v9 = vld [vmem:[#allocation5 + $0x8] sm:$0xff]  ;;  %v123_v18 = vld [vmem:[#allocation7 + $0x8] sm:$0xff] }
  0x4a   :  { %134 = vadd.xlane.f32.xlu0 %v133_v2  ;;  %v385_v10 = vsel %vm132_vm0, %v1196_v7, 0.0  ;;  %v393_v11 = vmul.f32 %v1196_v7, %v1196_v7  ;;  %v388_v12 = vsel %vm132_vm0, %v1199_v9, 0.0  ;;  %v394_v13 = vmul.f32 %v1199_v9, %v1199_v9  ;;  %v125_v16 = vld [vmem:[#allocation7 + $0x18] sm:$0xff]  ;;  %v124_v17 = vld [vmem:[#allocation7 + $0x10] sm:$0xff]  ;;  %v122_v19 = vld [vmem:[#allocation7] sm:$0xff] }
  0x4b   :  { %v143_v5 = vsel %vm132_vm0, %v141_v3, 0.0  ;;  %v146_v8 = vsel %vm132_vm0, %v142_v4, 0.0  ;;  %850 = vmatprep.subr.mxu0 %v125_v16  ;;  %v378_v20 = vld [vmem:[#allocation10 + $0x18] sm:$0xff]  ;;  %v377_v61 = vld [vmem:[#allocation10 + $0x10] sm:$0xff]  ;;  %v376_v2 = vld [vmem:[#allocation10 + $0x8] sm:$0xff]  ;;  %vm629_vm2 = vcmask 523264  }
  0x4c   :  { %144 = vadd.xlane.f32.xlu1 %v143_v5  ;;  %v395_v14 = vsel %vm132_vm0, %v393_v11, 0.0  ;;  %v398_v15 = vsel %vm132_vm0, %v394_v13, 0.0  ;;  %851 = vmatpush3.msra.mxu0 %v125_v16  ;;  %vm706_vm3 = vcmask 64512  }
  0x4d   :  { %852 = vmatprep.subr.mxu0 %v124_v17 }
  0x4e   :  { %137 = vadd.xlane.f32.xlu0 %v136_v6  ;;  %853 = vmatpush3.msra.mxu0 %v124_v17  ;;  %v812_v17 = vld [vmem:[%s1280_s7] ss:$0 sm:$0xff] }
  0x4f   :  { %854 = vmatprep.subr.mxu0 %v123_v18 }
  0x50   :  { %147 = vadd.xlane.f32.xlu1 %v146_v8  ;;  %855 = vmatpush3.msra.mxu0 %v123_v18  ;;  %v806_v8 = vld [vmem:[%s1276_s3] ss:$0 sm:$0xff] }
  0x51   :  { %856 = vmatprep.subr.mxu0 %v122_v19 }
  0x52   :  { %386 = vadd.xlane.f32.xlu0 %v385_v10  ;;  %857 = vmatpush3.msra.mxu0 %v122_v19 }
  0x53   :  { %872 = vmatprep.subr.mxu0 %v378_v20 }
  0x54   :  { %389 = vadd.xlane.f32.xlu1 %v388_v12 }
  0x56   :  { %396 = vadd.xlane.f32.xlu0 %v395_v14 }
  0x58   :  { %399 = vadd.xlane.f32.xlu1 %v398_v15 }
  0xd3   :  { %v135_v21 = vpop.xlane.xlu0 %134 }
  0xd4   :  { %v139_v22 = vmul.f32 0.03125, %v135_v21 }
  0xd5   :  { %v145_v23 = vpop.xlane.xlu1 %144 }
  0xd6   :  { %v151_v24 = vmul.f32 %v139_v22, %v139_v22  ;;  %v149_v25 = vmul.f32 0.03125, %v145_v23  ;;  %v157_v53 = vsub.f32 %v1183_v0, %v139_v22 }
  0xd7   :  { %v138_v26 = vpop.xlane.xlu0 %137 }
  0xd8   :  { %v153_v27 = vsub.f32 %v149_v25, %v151_v24  ;;  %v140_v28 = vmul.f32 0.03125, %v138_v26 }
  0xd9   :  { %v148_v29 = vpop.xlane.xlu1 %147 }
  0xda   :  { %v155_v30 = vmax.f32 %v153_v27, 0.0  ;;  %v152_v31 = vmul.f32 %v140_v28, %v140_v28  ;;  %v150_v32 = vmul.f32 0.03125, %v148_v29  ;;  %v158_v56 = vsub.f32 %v1185_v1, %v140_v28  ;;  %v375_v1 = vld [vmem:[#allocation10] sm:$0xff] }
  0xdb   :  { %v387_v33 = vpop.xlane.xlu0 %386 }
  0xdc   :  { %v159_v34 = vadd.f32 1e-05, %v155_v30  ;;  %v154_v35 = vsub.f32 %v150_v32, %v152_v31  ;;  %v391_v36 = vmul.f32 0.03125, %v387_v33  ;;  %v130_v30 = vld [vmem:[#allocation8 + $0x18] sm:$0xff]  ;;  %v129_v31 = vld [vmem:[#allocation8 + $0x10] sm:$0xff]  ;;  %v128_v32 = vld [vmem:[#allocation8 + $0x8] sm:$0xff] }
  0xdd   :  { %v390_v37 = vpop.xlane.xlu1 %389  ;;  %861 = vmatprep.subr.mxu1 %v130_v30  ;;  %v127_v33 = vld [vmem:[#allocation8] sm:$0xff] }
  0xde   :  { %915 = vrsqrt.f32 %v159_v34  ;;  %v156_v38 = vmax.f32 %v154_v35, 0.0  ;;  %v403_v39 = vmul.f32 %v391_v36, %v391_v36  ;;  %v392_v40 = vmul.f32 0.03125, %v390_v37  ;;  %862 = vmatpush3.msra.mxu1 %v130_v30  ;;  %v383_v34 = vld [vmem:[#allocation11 + $0x18] sm:$0xff]  ;;  %v815_v30 = vld [vmem:[%s1282_s9] ss:$0 sm:$0xff] }
  0xdf   :  { %v397_v41 = vpop.xlane.xlu0 %396  ;;  %v409_v62 = vsub.f32 %v1196_v7, %v391_v36  ;;  %863 = vmatprep.subr.mxu1 %v129_v31 }
  0xe0   :  { %v160_v42 = vadd.f32 1e-05, %v156_v38  ;;  %v401_v43 = vmul.f32 0.03125, %v397_v41  ;;  %v404_v45 = vmul.f32 %v392_v40, %v392_v40  ;;  %v410_v0 = vsub.f32 %v1199_v9, %v392_v40  ;;  %864 = vmatpush3.msra.mxu1 %v129_v31 }
  0xe1   :  { %v400_v44 = vpop.xlane.xlu1 %399  ;;  %865 = vmatprep.subr.mxu1 %v128_v32 }
  0xe2   :  { %917 = vrsqrt.f32 %v160_v42  ;;  %v405_v46 = vsub.f32 %v401_v43, %v403_v39  ;;  %v402_v47 = vmul.f32 0.03125, %v400_v44  ;;  %866 = vmatpush3.msra.mxu1 %v128_v32 }
  0xe3   :  { %867 = vmatprep.subr.mxu1 %v127_v33 }
  0xe4   :  { %v407_v48 = vmax.f32 %v405_v46, 0.0  ;;  %v406_v49 = vsub.f32 %v402_v47, %v404_v45  ;;  %868 = vmatpush3.msra.mxu1 %v127_v33 }
  0xe5   :  { %883 = vmatprep.subr.mxu1 %v383_v34 }
  0xe6   :  { %v411_v50 = vadd.f32 1e-05, %v407_v48  ;;  %v408_v51 = vmax.f32 %v406_v49, 0.0 }
  0xe8   :  { %919 = vrsqrt.f32 %v411_v50  ;;  %v412_v52 = vadd.f32 1e-05, %v408_v51 }
  0xea   :  { %921 = vrsqrt.f32 %v412_v52 }
  0xeb   :  { %v916_v54 = vpop.eup %915 }
  0xec   :  { %v163_v55 = vmul.f32 %v916_v54, %v157_v53 }
  0xee   :  { %v165_v57 = vmax.f32 %v163_v55, 0.0 }
  0xef   :  { %v918_v58 = vpop.eup %917 }
  0xf0   :  { %858 = vmatprep.mubr.msk.f32.mxu0 %vm132_vm0, %v165_v57  ;;  %v164_v59 = vmul.f32 %v918_v58, %v158_v56 }
  0xf2   :  { %v166_v60 = vmax.f32 %v164_v59, 0.0 }
  0xf4   :  { %859 = vmatmul.mubr.msk.f32.vlgmr.msra.gmra.mxu0 %vm132_vm0, %v166_v60 }
  0xf5   :  { %v920_v63 = vpop.eup %919  ;;  %873 = vmatpush3.msra.mxu0 %v378_v20 }
  0xf6   :  { %874 = vmatprep.subr.mxu0 %v377_v61  ;;  %v415_v3 = vmul.f32 %v920_v63, %v409_v62 }
  0xf7   :  { %v922_v4 = vpop.eup %921  ;;  %875 = vmatpush3.msra.mxu0 %v377_v61 }
  0xf8   :  { %876 = vmatprep.subr.mxu0 %v376_v2  ;;  %v417_v5 = vmax.f32 %v415_v3, 0.0  ;;  %v416_v6 = vmul.f32 %v922_v4, %v410_v0 }
  0xf9   :  { %877 = vmatpush3.msra.mxu0 %v376_v2 }
  0xfa   :  { %878 = vmatprep.subr.mxu0 %v375_v1  ;;  %880 = vmatprep.mubr.msk.f32.mxu0 %vm132_vm0, %v417_v5  ;;  %v418_v7 = vmax.f32 %v416_v6, 0.0 }
  0xfb   :  { %879 = vmatpush3.msra.mxu0 %v375_v1 }
  0xfc   :  { %881 = vmatmul.mubr.msk.f32.vlgmr.msra.gmra.mxu0 %vm132_vm0, %v418_v7 }
 0x1b4   :  { %v860_v9 = vpop.f32.mrf.mxu0 }
 0x1b5   :  { %v1222_v10 = vadd.f32 %v860_v9, %v806_v8 }
 0x1b6   :  { %v245_v11 = vpop.f32.mrf.mxu0 }
 0x1b7   :  { %v1224_v12 = vadd.f32 %v806_v8, %v245_v11  ;;  %v257_v13 = vsel %vm132_vm0, %v1222_v10, 0.0  ;;  %v263_v14 = vmul.f32 %v1222_v10, %v1222_v10 }
 0x1b8   :  { %258 = vadd.xlane.f32.xlu1 %v257_v13  ;;  %v382_v13 = vld [vmem:[#allocation11 + $0x10] sm:$0xff] }
 0x1b9   :  { %v254_v15 = vsel %vm132_vm0, %v1224_v12, 0.0  ;;  %v262_v16 = vmul.f32 %v1224_v12, %v1224_v12  ;;  %v267_v18 = vsel %vm132_vm0, %v263_v14, 0.0 }
 0x1ba   :  { %255 = vadd.xlane.f32.xlu0 %v254_v15 }
 0x1bb   :  { %v264_v21 = vsel %vm132_vm0, %v262_v16, 0.0 }
 0x1bc   :  { %268 = vadd.xlane.f32.xlu1 %v267_v18  ;;  %v882_v19 = vpop.f32.mrf.mxu0  ;;  %v380_v18 = vld [vmem:[#allocation11] sm:$0xff] }
 0x1bd   :  { %v1238_v20 = vadd.f32 %v882_v19, %v812_v17 }
 0x1be   :  { %265 = vadd.xlane.f32.xlu0 %v264_v21  ;;  %v497_v22 = vpop.f32.mrf.mxu0 }
 0x1bf   :  { %v1241_v23 = vadd.f32 %v812_v17, %v497_v22  ;;  %v509_v24 = vsel %vm132_vm0, %v1238_v20, 0.0  ;;  %v515_v25 = vmul.f32 %v1238_v20, %v1238_v20  ;;  %v381_v17 = vld [vmem:[#allocation11 + $0x8] sm:$0xff] }
 0x1c0   :  { %510 = vadd.xlane.f32.xlu1 %v509_v24 }
 0x1c1   :  { %v506_v26 = vsel %vm132_vm0, %v1241_v23, 0.0  ;;  %v514_v27 = vmul.f32 %v1241_v23, %v1241_v23  ;;  %v519_v28 = vsel %vm132_vm0, %v515_v25, 0.0 }
 0x1c2   :  { %507 = vadd.xlane.f32.xlu0 %v506_v26 }
 0x1c3   :  { %v516_v29 = vsel %vm132_vm0, %v514_v27, 0.0 }
 0x1c4   :  { %520 = vadd.xlane.f32.xlu1 %v519_v28 }
 0x1c6   :  { %517 = vadd.xlane.f32.xlu0 %v516_v29 }
 0x241   :  { %v259_v35 = vpop.xlane.xlu1 %258 }
 0x242   :  { %v261_v36 = vmul.f32 0.03125, %v259_v35 }
 0x243   :  { %v256_v37 = vpop.xlane.xlu0 %255 }
 0x244   :  { %v260_v38 = vmul.f32 0.03125, %v256_v37  ;;  %v273_v40 = vmul.f32 %v261_v36, %v261_v36  ;;  %v279_v1 = vsub.f32 %v1222_v10, %v261_v36 }
 0x245   :  { %v269_v39 = vpop.xlane.xlu1 %268 }
 0x246   :  { %v271_v41 = vmul.f32 0.03125, %v269_v39  ;;  %v272_v43 = vmul.f32 %v260_v38, %v260_v38  ;;  %v278_v5 = vsub.f32 %v1224_v12, %v260_v38 }
 0x247   :  { %v266_v42 = vpop.xlane.xlu0 %265 }
 0x248   :  { %v275_v44 = vsub.f32 %v271_v41, %v273_v40  ;;  %v270_v45 = vmul.f32 0.03125, %v266_v42 }
 0x249   :  { %v511_v46 = vpop.xlane.xlu1 %510 }
 0x24a   :  { %v277_v47 = vmax.f32 %v275_v44, 0.0  ;;  %v274_v48 = vsub.f32 %v270_v45, %v272_v43  ;;  %v513_v49 = vmul.f32 0.03125, %v511_v46 }
 0x24b   :  { %v508_v50 = vpop.xlane.xlu0 %507 }
 0x24c   :  { %v281_v51 = vadd.f32 1e-05, %v277_v47  ;;  %v276_v52 = vmax.f32 %v274_v48, 0.0  ;;  %v512_v53 = vmul.f32 0.03125, %v508_v50  ;;  %v525_v56 = vmul.f32 %v513_v49, %v513_v49 }
 0x24d   :  { %v521_v54 = vpop.xlane.xlu1 %520  ;;  %v531_v15 = vsub.f32 %v1238_v20, %v513_v49  ;;  %v1089_v20 = vmov 0.0  }
 0x24e   :  { %923 = vrsqrt.f32 %v281_v51  ;;  %v280_v55 = vadd.f32 1e-05, %v276_v52  ;;  %v523_v57 = vmul.f32 0.03125, %v521_v54  ;;  %v524_v59 = vmul.f32 %v512_v53, %v512_v53  ;;  %894 = vmatprep.subr.mxu0 %v1089_v20  ;;  %896 = vmatprep.mubr.msk.f32.mxu0 %vm1090_vm1, %v1089_v20 }
 0x24f   :  { %v518_v58 = vpop.xlane.xlu0 %517  ;;  %v530_v16 = vsub.f32 %v1241_v23, %v512_v53  ;;  %v809_v23 = vld [vmem:[%s1278_s5] ss:$0 sm:$0xff]  ;;  %s1091_s5 = smov [#allocation13]  }
 0x250   :  { %925 = vrsqrt.f32 %v280_v55  ;;  %v527_v60 = vsub.f32 %v523_v57, %v525_v56  ;;  %v522_v61 = vmul.f32 0.03125, %v518_v58  ;;  %s791_s27 = sshll.u32 %s1091_s5, 4  ;;  %s792_s27 = int_to_ptr.vmem [resolvable:$true] %s791_s27 }
 0x251   :  { %s1051_s28 = scalar_lea.vmem %s792_s27, 256  ;;  %p1056_p3 = scmp.lt.s32.totalorder %s792_s27, %s792_s27 }
 0x252   :  { %v529_v62 = vmax.f32 %v527_v60, 0.0  ;;  %v526_v63 = vsub.f32 %v522_v61, %v524_v59  ;;  %p1052_p2 = scmp.ne.s32.totalorder %s792_s27, %s1051_s28  ;;  %p1057_p4 = scmp.lt.s32.totalorder %s1051_s28, %s1051_s28 }
 0x254   :  { %v533_v2 = vadd.f32 1e-05, %v529_v62  ;;  %v528_v0 = vmax.f32 %v526_v63, 0.0  ;;  %p1058_p5 = por %p1057_p4, %p1056_p3 }
 0x256   :  { %927 = vrsqrt.f32 %v533_v2  ;;  %v532_v3 = vadd.f32 1e-05, %v528_v0  ;;  %p1059_p6 = pnand %p1058_p5, %p1052_p2 }
 0x258   :  { %929 = vrsqrt.f32 %v532_v3 }
 0x25b   :  { %v924_v4 = vpop.eup %923 }
 0x25c   :  { %v285_v7 = vmul.f32 %v924_v4, %v279_v1 }
 0x25d   :  { %v926_v6 = vpop.eup %925 }
 0x25e   :  { %v284_v8 = vmul.f32 %v926_v6, %v278_v5  ;;  %v287_v11 = vmax.f32 %v285_v7, 0.0 }
 0x260   :  { %v286_v9 = vmax.f32 %v284_v8, 0.0 }
 0x262   :  { %869 = vmatprep.mubr.msk.f32.mxu1 %vm132_vm0, %v286_v9 }
 0x263   :  { %v928_v14 = vpop.eup %927  ;;  %870 = vmatmul.mubr.msk.f32.vlgmr.msra.gmra.mxu1 %vm132_vm0, %v287_v11 }
 0x264   :  { %884 = vmatpush3.msra.mxu1 %v383_v34  ;;  %v537_v12 = vmul.f32 %v928_v14, %v531_v15 }
 0x265   :  { %v930_v10 = vpop.eup %929  ;;  %885 = vmatprep.subr.mxu1 %v382_v13 }
 0x266   :  { %886 = vmatpush3.msra.mxu1 %v382_v13  ;;  %v536_v19 = vmul.f32 %v930_v10, %v530_v16  ;;  %v539_v22 = vmax.f32 %v537_v12, 0.0 }
 0x267   :  { %887 = vmatprep.subr.mxu1 %v381_v17 }
 0x268   :  { %888 = vmatpush3.msra.mxu1 %v381_v17  ;;  %v538_v21 = vmax.f32 %v536_v19, 0.0 }
 0x269   :  { %889 = vmatprep.subr.mxu1 %v380_v18 }
 0x26a   :  { %890 = vmatpush3.msra.mxu1 %v380_v18  ;;  %891 = vmatprep.mubr.msk.f32.mxu1 %vm132_vm0, %v538_v21 }
 0x26b   :  { %892 = vmatmul.mubr.msk.f32.vlgmr.msra.gmra.mxu1 %vm132_vm0, %v539_v22  ;;  %899 = vmatprep.subr.mxu1 %v1089_v20 }
 0x26c   :  { %901 = vmatprep.mubr.msk.f32.mxu1 %vm1090_vm1, %v1089_v20 }
 0x323   :  { %v871_v24 = vpop.f32.mrf.mxu1 }
 0x324   :  { %v372_v25 = vadd.f32 %v871_v24, %v809_v23 }
 0x325   :  { %v366_v26 = vpop.f32.mrf.mxu1 }
 0x326   :  { %v628_v27 = vmul.f32 0.125, %v372_v25  ;;  %v367_v28 = vadd.f32 %v809_v23, %v366_v26 }
 0x328   :  { %v627_v29 = vmul.f32 0.125, %v367_v28  ;;  %900 = vmatpush3.xpose.msk.msra.mxu1 %vm629_vm2, %v628_v27 }
 0x32a   :  { %895 = vmatpush3.xpose.msk.msra.mxu0 %vm629_vm2, %v627_v29 }
 0x32b   :  { %v893_v31 = vpop.f32.mrf.mxu1 }
 0x32c   :  { %v624_v32 = vadd.f32 %v893_v31, %v815_v30 }
 0x32d   :  { %v618_v33 = vpop.f32.mrf.mxu1 }
 0x32e   :  { %v619_v34 = vadd.f32 %v815_v30, %v618_v33  ;;  %902 = vmatmul.mubr.msk.f32.vlgmr.msra.gmra.mxu1 %vm629_vm2, %v624_v32 }
 0x330   :  { %897 = vmatmul.mubr.msk.f32.vlgmr.msra.gmra.mxu0 %vm629_vm2, %v619_v34 }
 0x3ee   :  { %v780_v35 = vpop.f32.mrf.mxu1 }
 0x3ef   :  { %785 = vst.msk [vmem:[#allocation13 + $0x8] sm:$0xff] %vm706_vm3, %v780_v35 }
 0x3f0   :  { %v702_v36 = vpop.f32.mrf.mxu0  ;;  %v903_v37 = vpop.f32.mrf.mxu1 }
 0x3f1   :  { %707 = vst.msk [vmem:[#allocation13] sm:$0xff] %vm706_vm3, %v702_v36 }
 0x3f2   :  { %v898_v38 = vpop.f32.mrf.mxu0 }
 0x3f3   :  { %1062 = shalt.err (!%p1059_p6)
}
 0x3f4   :  { %797 = dma.vmem_to_hbm [thread:$0]  %s792_s27, 256, %s1283_s10, [#allocation4], %s1083_s18, %s1083_s18, %s1084_s19  }
 0x3f5   :  { %1079 = dma.done.wait [#allocation4], 256  }
 0x3f6   :  { %1080 = vsyncadd [#allocation4], 4294967040 }
 0x3f7   :  { %801 = vsyncpa [#allocation3], 1 }
 0x3f8   :  { %802 = vsyncpa [#allocation6], 1 }
 0x3f9   :  { %803 = vsyncpa [#allocation9], 1 }
 0x3fa   :  { %804 = vsyncpa [#allocation12], 1 }
 0x3fb   :  { %805 = vsyncpa [#allocation4], 1 }

</bundles_post_ra>
